<compile_context>
chip_gen: v7x
topology: tpu7x:2x2x1
jax: 0.10.0
libtpu: 0.0.40
codegen_flags: <defaults>
</compile_context>

<pallas_src>
import functools
import math

import numpy as np
import jax
import jax.numpy as jnp
from jax import lax
from jax.experimental import pallas as pl
from jax.experimental.pallas import tpu as pltpu

# ---- hyperparameters: Self_Attension_Net(time_length=160) -> consistent shapes ----
TIME_LENGTH = 160
T_IN = TIME_LENGTH // 20          # 8  : sequence length seen by the conv stack
L1, C1 = T_IN // 2, 8             # 4,8 : after Conv1d(1,8,k3,s2,p1)
L2, C2 = T_IN // 4, 16            # 2,16: after Conv1d(8,16,k3,s2,p1)
DQK = C2 // 8                     # 2  : query/key channels in SelfAttention
FLAT = L2 * C2                    # 32 = time_length*16//4
H1, H2, OUT = 512, 32, 4
EPS = 1e-6                        # F.pairwise_distance default eps

NV = C2 * L2 * L2                 # 64 : expanded value lanes  (c,i,j)
NQ = DQK * L2 * L2                # 8  : expanded q / k lanes  (d,i,j)

# single packed parameter blob: all offsets 8-row / 128-lane aligned
BLOB_ROWS, BLOB_COLS = 176, 512
PLACEMENT = {                     # name -> (row0, col0)
    'wc2':   (0, 0),              # (33, 33)
    'mqkv0': (0, 128),            # (33, 80)
    'mqkv1': (0, 256),            # (33, 80)
    'wf3':   (0, 384),            # (32, 4)
    'rvg0':  (40, 0),             # (64, 33)
    'rvg1':  (40, 128),           # (64, 33)
    'wc1':   (40, 256),           # (9, 33)
    'rsum':  (56, 256),           # (8, 4)
    'ba':    (64, 256),           # (4, 64)
    'gba':   (72, 256),           # (4, 64)
    'b2':    (80, 256),           # (1, 32)
    'b3':    (88, 256),           # (1, 4)
    'wf1':   (104, 0),            # (33, 512)
    'wf2t':  (144, 0),            # (32, 512)
}


# ------------------------------- Pallas kernel -------------------------------

def net_kernel(x_ref, p_ref, o_ref, *, bs, bq, q_off, lay):
    f32 = jnp.float32

    def ld(name):                          # static slice of the packed blob
        r0, c0, nr, nc = lay[name]
        return p_ref[r0:r0 + nr, c0:c0 + nc]

    # Conv1d(1,8,k3,s2,p1)+ReLU, Conv1d(8,16,k3,s2,p1)+ReLU as dense matmuls.
    # Biases ride in the last weight row; a constant-1 lane is carried through.
    h = jnp.maximum(jnp.dot(x_ref[...], ld('wc1'), preferred_element_type=f32), 0.0)
    h = jnp.maximum(jnp.dot(h, ld('wc2'), preferred_element_type=f32), 0.0)    # (B, 33)

    rsum = ld('rsum')   # (8, 4)  sum over d -> scores e[i,j]
    ba = ld('ba')       # (4, 64) softmax numerator broadcast over channels
    gba = ld('gba')     # (4, 64) precomposed group-sum (denominator) broadcast

    # Two SelfAttention blocks, per-sample, expressed purely along the lane axis.
    for layer in range(2):
        # fused V|Q|K projection: one matmul + static lane slices
        qkv = jnp.dot(h, ld('mqkv%d' % layer), preferred_element_type=f32)     # (B, 80)
        ve = qkv[:, 0:NV]                   # vE[c,i,j] = v[c,j]
        qe = qkv[:, NV:NV + NQ]             # qE[d,i,j] = q[d,i]
        ke = qkv[:, NV + NQ:NV + 2 * NQ]    # kE[d,i,j] = k[d,j]
        e = jnp.dot(qe * ke, rsum, preferred_element_type=f32)                 # (B, 4)
        # per-sample max (constant over keys -> softmax unchanged); XLU reduce,
        # keeps the group-max matmul chain off the serial MXU path
        m = jnp.max(e, axis=-1, keepdims=True)
        p = jnp.exp(e - m)
        num = jnp.dot(p, ba, preferred_element_type=f32)                       # (B, 64)
        den = jnp.dot(p, gba, preferred_element_type=f32)                      # (B, 64)
        ae = num * pl.reciprocal(jnp.maximum(den, 1e-30), approx=False)        # attn[i,j] per channel
        # rvg = gamma * (apply/reduce selector); its carry column is 0, so the
        # constant-1 lane of h survives the residual update.
        h = jnp.dot(ve * ae, ld('rvg%d' % layer), preferred_element_type=f32) + h

    # fc1 (+bias via constant-1 lane) + ReLU: exact 512-lane output (no carry column)
    z = jnp.maximum(jnp.dot(h, ld('wf1'), preferred_element_type=f32), 0.0)    # (B, 512)
    # fc2: weight stored in torch (out,in) layout -> NT contraction, bias row-add
    z = jnp.maximum(
        lax.dot_general(z, ld('wf2t'), (((1,), (1,)), ((), ())),
                        preferred_element_type=f32) + ld('b2'), 0.0)           # (B, 32)
    y = jnp.dot(z, ld('wf3'), preferred_element_type=f32) + ld('b3')           # (B, 4)

    # Fused pairwise L2 distance ||(s+eps) - q||: one cross matmul + two reductions.
    ys = y[0:bs, :] + EPS                                                      # (Bs, OUT)
    yqt = y[q_off:q_off + bq, :].T                                             # (OUT, Bq)
    cross = jnp.dot(ys, yqt, preferred_element_type=f32)                       # (Bs, Bq)
    ns = jnp.sum(ys * ys, axis=1, keepdims=True)                               # (Bs, 1)
    nq = jnp.sum(yqt * yqt, axis=0, keepdims=True)                             # (1, Bq)
    o_ref[...] = jnp.sqrt(jnp.maximum(ns + nq - 2.0 * cross, 0.0))


# ------------------------------- host-side glue -------------------------------

def conv1d_as_matmul_aug(w, b, l_in, stride=2, pad=1):
    """Conv1d -> dense matmul in channel-major flat layout (c*L + l) with a bias
    row and a constant-1 carry column appended."""
    w = np.asarray(w, np.float32)
    b = np.asarray(b, np.float32)
    c_out, c_in, k = w.shape
    l_out = (l_in + 2 * pad - k) // stride + 1
    rows, cols = c_in * l_in + 1, c_out * l_out + 1
    m = np.zeros((rows, cols), np.float32)
    for o in range(c_out):
        for j in range(l_out):
            for kk in range(k):
                p = j * stride - pad + kk
                if 0 <= p < l_in:
                    for c in range(c_in):
                        m[c * l_in + p, o * l_out + j] += w[o, c, kk]
            m[rows - 1, o * l_out + j] = b[o]
    m[rows - 1, cols - 1] = 1.0          # carry the constant-1 lane
    return m


def linear_with_bias_row(w, b):
    """Linear -> (Cin+1, Cout): weight.T with the bias in the last row (consumed by
    the constant-1 activation lane)."""
    w = np.asarray(w, np.float32)
    b = np.asarray(b, np.float32)
    cout, cin = w.shape
    m = np.zeros((cin + 1, cout), np.float32)
    m[:cin, :] = w.T
    m[cin, :] = b
    return m


def build_attention_mats(wq, bq, wk, bk, wv, bv):
    """Per-layer block matrices so attention runs entirely along the lane axis."""
    L, D, C = L2, DQK, C2
    wq = np.asarray(wq, np.float32); bq = np.asarray(bq, np.float32)
    wk = np.asarray(wk, np.float32); bk = np.asarray(bk, np.float32)
    wv = np.asarray(wv, np.float32); bv = np.asarray(bv, np.float32)

    mq = np.zeros((C * L + 1, D * L), np.float32)     # q[b,d,l] projection (+bias row)
    mk = np.zeros((C * L + 1, D * L), np.float32)
    for c in range(C):
        for d in range(D):
            for l in range(L):
                mq[c * L + l, d * L + l] = wq[d, c]
                mk[c * L + l, d * L + l] = wk[d, c]
    mq[C * L, :] = np.repeat(bq, L)
    mk[C * L, :] = np.repeat(bk, L)

    mv = np.zeros((C * L + 1, C * L), np.float32)     # v[b,c,l] projection (+bias row)
    for ci in range(C):
        for co in range(C):
            for l in range(L):
                mv[ci * L + l, co * L + l] = wv[co, ci]
    mv[C * L, :] = np.repeat(bv, L)

    # expansion selectors to index (d, i, j) / (c, i, j) along the lane axis
    aq = np.zeros((D * L, D * L * L), np.float32)     # qE[d,i,j] = q[d,i]
    ak = np.zeros((D * L, D * L * L), np.float32)     # kE[d,i,j] = k[d,j]
    for d in range(D):
        for i in range(L):
            for j in range(L):
                aq[d * L + i, d * L * L + i * L + j] = 1.0
                ak[d * L + j, d * L * L + i * L + j] = 1.0
    bv_sel = np.zeros((C * L, C * L * L), np.float32)  # vE[c,i,j] = v[c,j]
    for c in range(C):
        for i in range(L):
            for j in range(L):
                bv_sel[c * L + j, c * L * L + i * L + j] = 1.0

    return mq @ aq, mk @ ak, mv @ bv_sel              # (33,8), (33,8), (33,64)


def build_shared_selectors():
    """Layer-independent selectors: score reduce, numerator/denominator broadcast,
    apply/reduce (gamma folded later).  gba = gsum @ ba is precomposed."""
    L, D, C = L2, DQK, C2
    rsum = np.zeros((D * L * L, L * L), np.float32)    # sum over d -> e[i,j]
    gsum = np.zeros((L * L, L * L), np.float32)        # sum over j, broadcast back
    ba = np.zeros((L * L, C * L * L), np.float32)      # attn[i,j] broadcast over c
    rv = np.zeros((C * L * L, C * L + 1), np.float32)  # sum over j -> o[c,i]; carry col 0
    for i in range(L):
        for j in range(L):
            for d in range(D):
                rsum[d * L * L + i * L + j, i * L + j] = 1.0
            for j2 in range(L):
                gsum[i * L + j, i * L + j2] = 1.0
            for c in range(C):
                ba[i * L + j, c * L * L + i * L + j] = 1.0
                rv[c * L * L + i * L + j, c * L + i] = 1.0
    return rsum, ba, gsum @ ba, rv


def init_params(key):
    ks = iter(jax.random.split(key, 32))

    def conv_init(kw, kb, cout, cin, k):
        bound = 1.0 / math.sqrt(cin * k)
        w = jax.random.uniform(kw, (cout, cin, k), jnp.float32, -bound, bound)
        b = jax.random.uniform(kb, (cout,), jnp.float32, -bound, bound)
        return w, b

    def linear_init(kw, kb, cout, cin):
        std = math.sqrt(2.0 / (cin + cout))            # xavier_normal_
        w = std * jax.random.normal(kw, (cout, cin), jnp.float32)
        bound = 1.0 / math.sqrt(cin)
        b = jax.random.uniform(kb, (cout,), jnp.float32, -bound, bound)
        return w, b

    p = {}
    p['conv1_w'], p['conv1_b'] = conv_init(next(ks), next(ks), 8, 1, 3)
    p['conv2_w'], p['conv2_b'] = conv_init(next(ks), next(ks), 16, 8, 3)
    for i, name in enumerate(('sa1', 'sa2')):
        wq, bq = conv_init(next(ks), next(ks), DQK, C2, 1)
        wk, bk = conv_init(next(ks), next(ks), DQK, C2, 1)
        wv, bv = conv_init(next(ks), next(ks), C2, C2, 1)
        p[name + '_wq'], p[name + '_bq'] = wq[:, :, 0], bq
        p[name + '_wk'], p[name + '_bk'] = wk[:, :, 0], bk
        p[name + '_wv'], p[name + '_bv'] = wv[:, :, 0], bv
        # TODO(synk): SelfAttention class body is not in the reference source; SAGAN-style
        # assumed. gamma is set nonzero (SAGAN init is 0) so the attention path is exercised.
        p[name + '_gamma'] = jnp.float32(0.3 + 0.4 * i)
    p['fc1_w'], p['fc1_b'] = linear_init(next(ks), next(ks), H1, FLAT)
    p['fc2_w'], p['fc2_b'] = linear_init(next(ks), next(ks), H2, H1)
    p['fc3_w'], p['fc3_b'] = linear_init(next(ks), next(ks), OUT, H2)
    return p


def build_kernel_params(p):
    """Fold biases/gammas into matrices and pack everything into ONE f32 blob."""
    rsum, ba, gba, rv = build_shared_selectors()
    pieces = {
        'wc1': conv1d_as_matmul_aug(p['conv1_w'], p['conv1_b'], T_IN),      # (9, 33)
        'wc2': conv1d_as_matmul_aug(p['conv2_w'], p['conv2_b'], L1),        # (33, 33)
        'rsum': rsum, 'ba': ba, 'gba': gba,
        'wf1': linear_with_bias_row(p['fc1_w'], p['fc1_b']),                # (33, 512)
        'wf2t': np.asarray(p['fc2_w'], np.float32),                         # (32, 512) torch (out,in)
        'b2': np.asarray(p['fc2_b'], np.float32)[None, :],                  # (1, 32)
        'wf3': np.asarray(p['fc3_w'], np.float32).T,                        # (32, 4)
        'b3': np.asarray(p['fc3_b'], np.float32)[None, :],                  # (1, 4)
    }
    for i, name in enumerate(('sa1', 'sa2')):
        mqa, mka, mvb = build_attention_mats(
            p[name + '_wq'], p[name + '_bq'], p[name + '_wk'], p[name + '_bk'],
            p[name + '_wv'], p[name + '_bv'])
        pieces['mqkv%d' % i] = np.concatenate([mvb, mqa, mka], axis=1)      # (33, 80) V|Q|K
        pieces['rvg%d' % i] = float(p[name + '_gamma']) * rv                # (64, 33)

    blob = np.zeros((BLOB_ROWS, BLOB_COLS), np.float32)
    used = np.zeros((BLOB_ROWS, BLOB_COLS), bool)
    layout = {}
    for name, arr in pieces.items():
        arr = np.asarray(arr, np.float32)
        r0, c0 = PLACEMENT[name]
        nr, nc = arr.shape
        assert r0 % 8 == 0 and c0 % 128 == 0, name
        assert r0 + nr <= BLOB_ROWS and c0 + nc <= BLOB_COLS, name
        assert not used[r0:r0 + nr, c0:c0 + nc].any(), name
        used[r0:r0 + nr, c0:c0 + nc] = True
        blob[r0:r0 + nr, c0:c0 + nc] = arr
        layout[name] = (r0, c0, nr, nc)
    return jnp.asarray(blob), layout


def make_forward(layout):
    """Build the jitted forward; `layout` (static slice offsets) is closed over."""

    @jax.jit
    def forward(sup_inp, que_inp, blob):
        """sup_inp/que_inp: (B, T_IN, 1), matching the torch forward's pre-permute layout."""
        bs, bq = sup_inp.shape[0], que_inp.shape[0]
        bs_pad = max(8, ((bs + 7) // 8) * 8)           # query rows start sublane-aligned
        xs = jnp.concatenate([sup_inp[..., 0], jnp.ones((bs, 1), jnp.float32)], axis=1)
        xq = jnp.concatenate([que_inp[..., 0], jnp.ones((bq, 1), jnp.float32)], axis=1)
        x = jnp.concatenate(
            [xs, jnp.zeros((bs_pad - bs, T_IN + 1), jnp.float32), xq], axis=0)

        kernel = functools.partial(net_kernel, bs=bs, bq=bq, q_off=bs_pad, lay=layout)
        d = pl.pallas_call(
            kernel,
            out_shape=jax.ShapeDtypeStruct((bs, bq), jnp.float32),
            in_specs=[pl.BlockSpec(memory_space=pltpu.MemorySpace.VMEM)] * 2,
            out_specs=pl.BlockSpec(memory_space=pltpu.MemorySpace.VMEM),
        )(x, blob)
        # row-major flatten of (Bs, Bq) == torch repeat_interleave / repeat pairing
        return d.reshape(-1)

    return forward


# ------------------------------- pure-JAX reference -------------------------------

def conv1d_ref(x, w, b, stride=2, pad=1):
    _, _, l = x.shape
    c_out, _, k = w.shape
    xp = jnp.pad(x, ((0, 0), (0, 0), (pad, pad)))
    l_out = (l + 2 * pad - k) // stride + 1
    cols = jnp.stack([xp[:, :, j * stride:j * stride + k] for j in range(l_out)], axis=2)
    return jnp.einsum('bclk,ock->bol', cols, w) + b[None, :, None]


def reference_forward(sup, que, p):
    def sa(h, wq, bq, wk, bk, wv, bv, g):
        q = jnp.einsum('dc,bcl->bdl', wq, h) + bq[None, :, None]
        k = jnp.einsum('dc,bcl->bdl', wk, h) + bk[None, :, None]
        v = jnp.einsum('oc,bcl->bol', wv, h) + bv[None, :, None]
        e = jnp.einsum('bdi,bdj->bij', q, k)
        a = jax.nn.softmax(e, axis=-1)
        o = jnp.einsum('bcj,bij->bci', v, a)
        return g * o + h

    def net(x_bt1):
        x = jnp.transpose(x_bt1, (0, 2, 1))            # (B,1,T)
        h = jax.nn.relu(conv1d_ref(x, p['conv1_w'], p['conv1_b']))
        h = jax.nn.relu(conv1d_ref(h, p['conv2_w'], p['conv2_b']))
        for name in ('sa1', 'sa2'):
            h = sa(h, p[name + '_wq'], p[name + '_bq'], p[name + '_wk'], p[name + '_bk'],
                   p[name + '_wv'], p[name + '_bv'], p[name + '_gamma'])
        flat = h.reshape(h.shape[0], -1)               # torch Flatten (channel-major)
        z = jax.nn.relu(flat @ p['fc1_w'].T + p['fc1_b'])
        z = jax.nn.relu(z @ p['fc2_w'].T + p['fc2_b'])
        return z @ p['fc3_w'].T + p['fc3_b']

    ys, yq = net(sup), net(que)
    d = jnp.sqrt(jnp.sum((ys[:, None, :] - yq[None, :, :] + EPS) ** 2, axis=-1))
    return d.reshape(-1)


# ------------------------------------ main ------------------------------------

if __name__ == "__main__":
    key = jax.random.PRNGKey(0)
    kp, ksup, kque = jax.random.split(key, 3)
    params = init_params(kp)
    blob, layout = build_kernel_params(params)
    forward = make_forward(layout)

    bz_sup, bz_que = 2, 3
    sup = jax.random.normal(ksup, (bz_sup, T_IN, 1), jnp.float32)
    que = jax.random.normal(kque, (bz_que, T_IN, 1), jnp.float32)

    out = jax.block_until_ready(forward(sup, que, blob))
    assert out.shape == (bz_sup * bz_que,)

    ref = jax.block_until_ready(reference_forward(sup, que, params))
    np.testing.assert_allclose(np.asarray(out), np.asarray(ref), rtol=1e-3, atol=1e-3)

    print("KERNEL_OK")
</pallas_src>

<mosaic_0001>
module attributes {stable_mosaic.version = 11 : i64} {
  func.func @net_kernel(%arg0: memref<11x9xf32, #tpu.memory_space<vmem>>, %arg1: memref<176x512xf32, #tpu.memory_space<vmem>>, %arg2: memref<2x3xf32, #tpu.memory_space<vmem>>) attributes {dimension_semantics = [], scalar_prefetch = 0 : i64, scratch_operands = 0 : i64, tpu.core_type = #tpu.core_type<tc>} {
    %c0 = arith.constant 0 : index
    %c0_0 = arith.constant 0 : index
    %0 = vector.load %arg0[%c0, %c0_0] : memref<11x9xf32, #tpu.memory_space<vmem>>, vector<11x9xf32>
    %c40 = arith.constant 40 : index
    %c256 = arith.constant 256 : index
    %1 = vector.load %arg1[%c40, %c256] : memref<176x512xf32, #tpu.memory_space<vmem>>, vector<9x33xf32>
    %cst = arith.constant dense<0.000000e+00> : vector<11x33xf32>
    %2 = tpu.matmul %0, %1, %cst {dimension_numbers = #tpu.dot_dimension_numbers<[1], [0], [0], [1], [0, 0, 1, 1], [], []>} : vector<11x9xf32>, vector<9x33xf32>, vector<11x33xf32> -> vector<11x33xf32>
    %cst_1 = arith.constant 0.000000e+00 : f32
    %3 = vector.broadcast %cst_1 : f32 to vector<11x33xf32>
    %4 = arith.maximumf %2, %3 : vector<11x33xf32>
    %c0_2 = arith.constant 0 : index
    %c0_3 = arith.constant 0 : index
    %5 = vector.load %arg1[%c0_2, %c0_3] : memref<176x512xf32, #tpu.memory_space<vmem>>, vector<33x33xf32>
    %cst_4 = arith.constant dense<0.000000e+00> : vector<11x33xf32>
    %6 = tpu.matmul %4, %5, %cst_4 {dimension_numbers = #tpu.dot_dimension_numbers<[1], [0], [0], [1], [0, 0, 1, 1], [], []>} : vector<11x33xf32>, vector<33x33xf32>, vector<11x33xf32> -> vector<11x33xf32>
    %cst_5 = arith.constant 0.000000e+00 : f32
    %7 = vector.broadcast %cst_5 : f32 to vector<11x33xf32>
    %8 = arith.maximumf %6, %7 : vector<11x33xf32>
    %c56 = arith.constant 56 : index
    %c256_6 = arith.constant 256 : index
    %9 = vector.load %arg1[%c56, %c256_6] : memref<176x512xf32, #tpu.memory_space<vmem>>, vector<8x4xf32>
    %c64 = arith.constant 64 : index
    %c256_7 = arith.constant 256 : index
    %10 = vector.load %arg1[%c64, %c256_7] : memref<176x512xf32, #tpu.memory_space<vmem>>, vector<4x64xf32>
    %c72 = arith.constant 72 : index
    %c256_8 = arith.constant 256 : index
    %11 = vector.load %arg1[%c72, %c256_8] : memref<176x512xf32, #tpu.memory_space<vmem>>, vector<4x64xf32>
    %c0_9 = arith.constant 0 : index
    %c128 = arith.constant 128 : index
    %12 = vector.load %arg1[%c0_9, %c128] : memref<176x512xf32, #tpu.memory_space<vmem>>, vector<33x80xf32>
    %cst_10 = arith.constant dense<0.000000e+00> : vector<11x80xf32>
    %13 = tpu.matmul %8, %12, %cst_10 {dimension_numbers = #tpu.dot_dimension_numbers<[1], [0], [0], [1], [0, 0, 1, 1], [], []>} : vector<11x33xf32>, vector<33x80xf32>, vector<11x80xf32> -> vector<11x80xf32>
    %14 = vector.extract_strided_slice %13 {offsets = [0, 0], sizes = [11, 64], strides = [1, 1]} : vector<11x80xf32> to vector<11x64xf32>
    %15 = vector.extract_strided_slice %13 {offsets = [0, 64], sizes = [11, 8], strides = [1, 1]} : vector<11x80xf32> to vector<11x8xf32>
    %16 = vector.extract_strided_slice %13 {offsets = [0, 72], sizes = [11, 8], strides = [1, 1]} : vector<11x80xf32> to vector<11x8xf32>
    %17 = arith.mulf %15, %16 : vector<11x8xf32>
    %cst_11 = arith.constant dense<0.000000e+00> : vector<11x4xf32>
    %18 = tpu.matmul %17, %9, %cst_11 {dimension_numbers = #tpu.dot_dimension_numbers<[1], [0], [0], [1], [0, 0, 1, 1], [], []>} : vector<11x8xf32>, vector<8x4xf32>, vector<11x4xf32> -> vector<11x4xf32>
    %cst_12 = arith.constant dense<0xFF800000> : vector<11xf32>
    %19 = vector.multi_reduction <maximumf>, %18, %cst_12 [1] : vector<11x4xf32> to vector<11xf32>
    %20 = vector.shape_cast %19 : vector<11xf32> to vector<11x1xf32>
    %21 = vector.broadcast %20 : vector<11x1xf32> to vector<11x4xf32>
    %22 = arith.subf %18, %21 : vector<11x4xf32>
    %23 = math.exp %22 : vector<11x4xf32>
    %cst_13 = arith.constant dense<0.000000e+00> : vector<11x64xf32>
    %24 = tpu.matmul %23, %10, %cst_13 {dimension_numbers = #tpu.dot_dimension_numbers<[1], [0], [0], [1], [0, 0, 1, 1], [], []>} : vector<11x4xf32>, vector<4x64xf32>, vector<11x64xf32> -> vector<11x64xf32>
    %cst_14 = arith.constant dense<0.000000e+00> : vector<11x64xf32>
    %25 = tpu.matmul %23, %11, %cst_14 {dimension_numbers = #tpu.dot_dimension_numbers<[1], [0], [0], [1], [0, 0, 1, 1], [], []>} : vector<11x4xf32>, vector<4x64xf32>, vector<11x64xf32> -> vector<11x64xf32>
    %cst_15 = arith.constant 1.000000e-30 : f32
    %26 = vector.broadcast %cst_15 : f32 to vector<11x64xf32>
    %27 = arith.maximumf %25, %26 : vector<11x64xf32>
    %28 = tpu.reciprocal %27 : vector<11x64xf32> -> vector<11x64xf32>
    %29 = arith.mulf %24, %28 : vector<11x64xf32>
    %30 = arith.mulf %14, %29 : vector<11x64xf32>
    %c40_16 = arith.constant 40 : index
    %c0_17 = arith.constant 0 : index
    %31 = vector.load %arg1[%c40_16, %c0_17] : memref<176x512xf32, #tpu.memory_space<vmem>>, vector<64x33xf32>
    %cst_18 = arith.constant dense<0.000000e+00> : vector<11x33xf32>
    %32 = tpu.matmul %30, %31, %cst_18 {dimension_numbers = #tpu.dot_dimension_numbers<[1], [0], [0], [1], [0, 0, 1, 1], [], []>} : vector<11x64xf32>, vector<64x33xf32>, vector<11x33xf32> -> vector<11x33xf32>
    %33 = arith.addf %32, %8 : vector<11x33xf32>
    %c0_19 = arith.constant 0 : index
    %c256_20 = arith.constant 256 : index
    %34 = vector.load %arg1[%c0_19, %c256_20] : memref<176x512xf32, #tpu.memory_space<vmem>>, vector<33x80xf32>
    %cst_21 = arith.constant dense<0.000000e+00> : vector<11x80xf32>
    %35 = tpu.matmul %33, %34, %cst_21 {dimension_numbers = #tpu.dot_dimension_numbers<[1], [0], [0], [1], [0, 0, 1, 1], [], []>} : vector<11x33xf32>, vector<33x80xf32>, vector<11x80xf32> -> vector<11x80xf32>
    %36 = vector.extract_strided_slice %35 {offsets = [0, 0], sizes = [11, 64], strides = [1, 1]} : vector<11x80xf32> to vector<11x64xf32>
    %37 = vector.extract_strided_slice %35 {offsets = [0, 64], sizes = [11, 8], strides = [1, 1]} : vector<11x80xf32> to vector<11x8xf32>
    %38 = vector.extract_strided_slice %35 {offsets = [0, 72], sizes = [11, 8], strides = [1, 1]} : vector<11x80xf32> to vector<11x8xf32>
    %39 = arith.mulf %37, %38 : vector<11x8xf32>
    %cst_22 = arith.constant dense<0.000000e+00> : vector<11x4xf32>
    %40 = tpu.matmul %39, %9, %cst_22 {dimension_numbers = #tpu.dot_dimension_numbers<[1], [0], [0], [1], [0, 0, 1, 1], [], []>} : vector<11x8xf32>, vector<8x4xf32>, vector<11x4xf32> -> vector<11x4xf32>
    %cst_23 = arith.constant dense<0xFF800000> : vector<11xf32>
    %41 = vector.multi_reduction <maximumf>, %40, %cst_23 [1] : vector<11x4xf32> to vector<11xf32>
    %42 = vector.shape_cast %41 : vector<11xf32> to vector<11x1xf32>
    %43 = vector.broadcast %42 : vector<11x1xf32> to vector<11x4xf32>
    %44 = arith.subf %40, %43 : vector<11x4xf32>
    %45 = math.exp %44 : vector<11x4xf32>
    %cst_24 = arith.constant dense<0.000000e+00> : vector<11x64xf32>
    %46 = tpu.matmul %45, %10, %cst_24 {dimension_numbers = #tpu.dot_dimension_numbers<[1], [0], [0], [1], [0, 0, 1, 1], [], []>} : vector<11x4xf32>, vector<4x64xf32>, vector<11x64xf32> -> vector<11x64xf32>
    %cst_25 = arith.constant dense<0.000000e+00> : vector<11x64xf32>
    %47 = tpu.matmul %45, %11, %cst_25 {dimension_numbers = #tpu.dot_dimension_numbers<[1], [0], [0], [1], [0, 0, 1, 1], [], []>} : vector<11x4xf32>, vector<4x64xf32>, vector<11x64xf32> -> vector<11x64xf32>
    %cst_26 = arith.constant 1.000000e-30 : f32
    %48 = vector.broadcast %cst_26 : f32 to vector<11x64xf32>
    %49 = arith.maximumf %47, %48 : vector<11x64xf32>
    %50 = tpu.reciprocal %49 : vector<11x64xf32> -> vector<11x64xf32>
    %51 = arith.mulf %46, %50 : vector<11x64xf32>
    %52 = arith.mulf %36, %51 : vector<11x64xf32>
    %c40_27 = arith.constant 40 : index
    %c128_28 = arith.constant 128 : index
    %53 = vector.load %arg1[%c40_27, %c128_28] : memref<176x512xf32, #tpu.memory_space<vmem>>, vector<64x33xf32>
    %cst_29 = arith.constant dense<0.000000e+00> : vector<11x33xf32>
    %54 = tpu.matmul %52, %53, %cst_29 {dimension_numbers = #tpu.dot_dimension_numbers<[1], [0], [0], [1], [0, 0, 1, 1], [], []>} : vector<11x64xf32>, vector<64x33xf32>, vector<11x33xf32> -> vector<11x33xf32>
    %55 = arith.addf %54, %33 : vector<11x33xf32>
    %c104 = arith.constant 104 : index
    %c0_30 = arith.constant 0 : index
    %56 = vector.load %arg1[%c104, %c0_30] : memref<176x512xf32, #tpu.memory_space<vmem>>, vector<33x512xf32>
    %cst_31 = arith.constant dense<0.000000e+00> : vector<11x512xf32>
    %57 = tpu.matmul %55, %56, %cst_31 {dimension_numbers = #tpu.dot_dimension_numbers<[1], [0], [0], [1], [0, 0, 1, 1], [], []>} : vector<11x33xf32>, vector<33x512xf32>, vector<11x512xf32> -> vector<11x512xf32>
    %cst_32 = arith.constant 0.000000e+00 : f32
    %58 = vector.broadcast %cst_32 : f32 to vector<11x512xf32>
    %59 = arith.maximumf %57, %58 : vector<11x512xf32>
    %c144 = arith.constant 144 : index
    %c0_33 = arith.constant 0 : index
    %60 = vector.load %arg1[%c144, %c0_33] : memref<176x512xf32, #tpu.memory_space<vmem>>, vector<32x512xf32>
    %cst_34 = arith.constant dense<0.000000e+00> : vector<11x32xf32>
    %61 = tpu.matmul %59, %60, %cst_34 {dimension_numbers = #tpu.dot_dimension_numbers<[1], [1], [0], [0], [0, 0, 1, 0], [], []>} : vector<11x512xf32>, vector<32x512xf32>, vector<11x32xf32> -> vector<11x32xf32>
    %c80 = arith.constant 80 : index
    %c256_35 = arith.constant 256 : index
    %62 = vector.load %arg1[%c80, %c256_35] : memref<176x512xf32, #tpu.memory_space<vmem>>, vector<1x32xf32>
    %63 = vector.broadcast %62 : vector<1x32xf32> to vector<11x32xf32>
    %64 = arith.addf %61, %63 : vector<11x32xf32>
    %cst_36 = arith.constant 0.000000e+00 : f32
    %65 = vector.broadcast %cst_36 : f32 to vector<11x32xf32>
    %66 = arith.maximumf %64, %65 : vector<11x32xf32>
    %c0_37 = arith.constant 0 : index
    %c384 = arith.constant 384 : index
    %67 = vector.load %arg1[%c0_37, %c384] : memref<176x512xf32, #tpu.memory_space<vmem>>, vector<32x4xf32>
    %cst_38 = arith.constant dense<0.000000e+00> : vector<11x4xf32>
    %68 = tpu.matmul %66, %67, %cst_38 {dimension_numbers = #tpu.dot_dimension_numbers<[1], [0], [0], [1], [0, 0, 1, 1], [], []>} : vector<11x32xf32>, vector<32x4xf32>, vector<11x4xf32> -> vector<11x4xf32>
    %c88 = arith.constant 88 : index
    %c256_39 = arith.constant 256 : index
    %69 = vector.load %arg1[%c88, %c256_39] : memref<176x512xf32, #tpu.memory_space<vmem>>, vector<1x4xf32>
    %70 = vector.broadcast %69 : vector<1x4xf32> to vector<11x4xf32>
    %71 = arith.addf %68, %70 : vector<11x4xf32>
    %72 = vector.extract_strided_slice %71 {offsets = [0, 0], sizes = [2, 4], strides = [1, 1]} : vector<11x4xf32> to vector<2x4xf32>
    %cst_40 = arith.constant 9.99999997E-7 : f32
    %73 = vector.broadcast %cst_40 : f32 to vector<2x4xf32>
    %74 = arith.addf %72, %73 : vector<2x4xf32>
    %75 = vector.extract_strided_slice %71 {offsets = [8, 0], sizes = [3, 4], strides = [1, 1]} : vector<11x4xf32> to vector<3x4xf32>
    %76 = tpu.transpose %75, [1, 0] : vector<3x4xf32> -> vector<4x3xf32>
    %cst_41 = arith.constant dense<0.000000e+00> : vector<2x3xf32>
    %77 = tpu.matmul %74, %76, %cst_41 {dimension_numbers = #tpu.dot_dimension_numbers<[1], [0], [0], [1], [0, 0, 1, 1], [], []>} : vector<2x4xf32>, vector<4x3xf32>, vector<2x3xf32> -> vector<2x3xf32>
    %78 = arith.mulf %74, %74 : vector<2x4xf32>
    %cst_42 = arith.constant dense<0.000000e+00> : vector<2xf32>
    %79 = vector.multi_reduction <add>, %78, %cst_42 [1] : vector<2x4xf32> to vector<2xf32>
    %80 = vector.shape_cast %79 : vector<2xf32> to vector<2x1xf32>
    %81 = arith.mulf %76, %76 : vector<4x3xf32>
    %cst_43 = arith.constant dense<0.000000e+00> : vector<3xf32>
    %82 = vector.multi_reduction <add>, %81, %cst_43 [0] : vector<4x3xf32> to vector<3xf32>
    %83 = vector.shape_cast %82 : vector<3xf32> to vector<1x3xf32>
    %84 = vector.broadcast %80 : vector<2x1xf32> to vector<2x3xf32>
    %85 = vector.broadcast %83 : vector<1x3xf32> to vector<2x3xf32>
    %86 = arith.addf %84, %85 : vector<2x3xf32>
    %cst_44 = arith.constant 2.000000e+00 : f32
    %87 = vector.broadcast %cst_44 : f32 to vector<2x3xf32>
    %88 = arith.mulf %87, %77 : vector<2x3xf32>
    %89 = arith.subf %86, %88 : vector<2x3xf32>
    %cst_45 = arith.constant 0.000000e+00 : f32
    %90 = vector.broadcast %cst_45 : f32 to vector<2x3xf32>
    %91 = arith.maximumf %89, %90 : vector<2x3xf32>
    %92 = math.sqrt %91 : vector<2x3xf32>
    %c0_46 = arith.constant 0 : index
    %c0_47 = arith.constant 0 : index
    %93 = vector.load %arg2[%c0_46, %c0_47] : memref<2x3xf32, #tpu.memory_space<vmem>>, vector<2x3xf32>
    tpu.vector_store %arg2[%c0_46, %c0_47], %92 {strides = array<i32>} : memref<2x3xf32, #tpu.memory_space<vmem>>, vector<2x3xf32>,
    return
  }
}

</mosaic_0001>

<bundles_post_ra>
// kernel: forward.1
= control target key start
LH: loop header
LB: loop body
LE: loop exit
PB: predicated region body
PF: predicated region fallthrough
CT: control target
= control target key end

     0   :  { %7 = vsyncpa [#allocation3], 0  ;;  %s2121_s9 = smov [#allocation2]   ;;  %s2292_s0 = inlined_call_operand.vmem [shape: f32[11,9], index: 0, kind: input, shape index: {}]   ;;  %s2293_s1 = inlined_call_operand.hbm [shape: f32[176,512], index: 1, kind: input, shape index: {}]   ;;  %s2294_s2 = inlined_call_operand.vmem [shape: f32[2,3], index: 2, kind: output, shape index: {}]  }
   0x1   :  { %s15_s10 = sshll.u32 %s2121_s9, 4  ;;  %s2097_s13 = scalar_lea.hbm %s2293_s1, 11264  ;;  %s16_s10 = int_to_ptr.vmem [resolvable:$true] %s15_s10 }
   0x2   :  { %p2098_p0 = scmp.ne.s32.totalorder %s2293_s1, %s2097_s13  ;;  %p2101_p1 = scmp.lt.u32.totalorder %s2097_s13, %s2293_s1 }
   0x4   :  { %p2103_p2 = pnand %p2101_p1, %p2098_p0 }
   0x6   :  { %2106 = shalt.err (!%p2103_p2)
}
   0x7   :  { %s2107_s18 = scalar_lea.vmem %s16_s10, 11264  ;;  %p2112_p4 = scmp.lt.s32.totalorder %s16_s10, %s16_s10 }
   0x8   :  { %p2108_p3 = scmp.ne.s32.totalorder %s16_s10, %s2107_s18  ;;  %p2113_p5 = scmp.lt.s32.totalorder %s2107_s18, %s2107_s18 }
   0xa   :  { %p2114_p6 = por %p2113_p5, %p2112_p4 }
   0xc   :  { %p2115_p7 = pnand %p2114_p6, %p2108_p3 }
   0xe   :  { %2118 = shalt.err (!%p2115_p7)
}
   0xf   :  { %s2122_s19 = smov 512   ;;  %s2123_s20 = smov 32  }
  0x10   :  { %21 = dma.hbm_to_vmem [thread:$0]  %s2293_s1, 11264, %s16_s10, [#allocation3], %s2122_s19, %s2122_s19, %s2123_s20  }
  0x11   :  { %2119 = dma.done.wait [#allocation3], 11264  }
  0x12   :  { %2120 = vsyncadd [#allocation3], 4294956032  ;;  %vm36_vm0 = vcmask 1040384   ;;  %vm29_vm1 = vcmask 72704   ;;  %vm2124_vm2 = vmmov 1   ;;  %v27_v0 = vld [vmem:[#allocation2 + $0xb0] sm:$0xff] }
  0x13   :  { %vm1964_vm3 = vmpackc.low %vm36_vm0, %vm2124_vm2  ;;  %v28_v1 = vld [vmem:[#allocation2 + $0xd0] sm:$0x1]  ;;  %v25_v2 = vld [vmem:[%s2292_s0] sm:$0xff]  ;;  %vm122_vm4 = vcmask 269312   ;;  %s2126_s26 = smov 64   ;;  %vm317_vm5 = vcmask 64512  }
  0x14   :  { %v1963_v3 = vpack.c.bf16 %v28_v1, %v27_v0  ;;  %1837 = vmatprep.mubr.msk.f32.mxu0 %vm29_vm1, %v25_v2  ;;  %v117_v4 = vld [vmem:[#allocation2] sm:$0xff]  ;;  %v26_v9 = vld [vmem:[%s2292_s0 + $0x8] sm:$0x7]  ;;  %s2125_s0 = smov 120   ;;  %v2191_v29 = vld [vmem:[#allocation2 + $0xf0] sm:$0xff]  ;;  %vm401_vm6 = vcmask 26624  }
  0x15   :  { %v118_v5 = vld [vmem:[#allocation2 + $0x20] sm:$0xff]  ;;  %v212_v12 = vld [vmem:[#allocation2 + $0x8] sm:$0xff]  ;;  %1866 = vmatprep.subr.mxu1 %v2191_v29  ;;  %vm397_vm7 = vcmask 31744   ;;  %v2203_v40 = vld [vmem:[#allocation2 + $0x110] sm:$0xf]  ;;  %vm417_vm8 = vcmask 1043456  }
  0x16   :  { %v1969_v6 = vpack.c.bf16 %v118_v5, %v117_v4  ;;  %v119_v7 = vld [vmem:[#allocation2 + $0x40] sm:$0xff]  ;;  %1965 = vmatprep.subr.msk.bf16.mxu0 %vm1964_vm3, %v1963_v3  ;;  %v213_v13 = vld [vmem:[#allocation2 + $0x28] sm:$0xff]  ;;  %1867 = vmatpush3.msra.mxu1 %v2191_v29  ;;  %v2205_v41 = vld [vmem:[#allocation2 + $0x130] sm:$0xf]  ;;  %vm590_vm9 = vcmask 523264   ;;  %vm1495_vm10 = vcmask 261120  }
  0x17   :  { %v120_v8 = vld [vmem:[#allocation2 + $0x60] sm:$0xff]  ;;  %1968 = vmatpush3.bf16.msk.msra.mxu0 %vm1964_vm3, %v1963_v3  ;;  %v1977_v14 = vpack.c.bf16 %v213_v13, %v212_v12  ;;  %v214_v16 = vld [vmem:[#allocation2 + $0x48] sm:$0xff]  ;;  %1876 = vmatprep.subr.msk.mxu1 %vm417_vm8, %v2205_v41  ;;  %v672_v62 = vld [vmem:[#allocation2 + $0x10] sm:$0xff]  ;;  %vm2128_vm11 = vmmov 0   ;;  %vm1687_vm12 = vcmask 25600   ;;  %vm1692_vm13 = vcmask 19456  }
  0x18   :  { %1970 = vmatprep.subr.bf16.mxu0 %v1969_v6  ;;  %v1973_v10 = vpack.c.bf16 %v120_v8, %v119_v7  ;;  %v121_v11 = vld [vmem:[#allocation2 + $0x80] sm:$0x1]  ;;  %v215_v17 = vld [vmem:[#allocation2 + $0x68] sm:$0xff]  ;;  %v673_v63 = vld [vmem:[#allocation2 + $0x30] sm:$0xff]  ;;  %vm1711_vm15 = vcmask 17408  }
  0x19   :  { %v1981_v21 = vpack.c.bf16 %v215_v17, %v214_v16  ;;  %v216_v22 = vld [vmem:[#allocation2 + $0x88] sm:$0x1]  ;;  %v582_v50 = vld [vmem:[#allocation2 + $0xa0] sm:$0xff]  ;;  %v674_v0 = vld [vmem:[#allocation2 + $0x50] sm:$0xff]  ;;  %v2001_v1 = vpack.c.bf16 %v673_v63, %v672_v62 }
  0x1a   :  { %1838 = vmatmul.mubr.msk.f32.vlgmr.msra.gmra.mrb[0].mxu0 %vm29_vm1, %v26_v9  ;;  %v583_v51 = vld [vmem:[#allocation2 + $0xc0] sm:$0xff]  ;;  %v675_v2 = vld [vmem:[#allocation2 + $0x70] sm:$0xff] }
  0x1b   :  { %1972 = vmatpush3.bf16.msra.mxu0 %v1969_v6  ;;  %v1985_v52 = vpack.c.bf16 %v583_v51, %v582_v50  ;;  %v584_v53 = vld [vmem:[#allocation2 + $0xe0] sm:$0xff]  ;;  %v2005_v3 = vpack.c.bf16 %v675_v2, %v674_v0  ;;  %v676_v16 = vld [vmem:[#allocation2 + $0x90] sm:$0x1]  ;;  %v1038_v50 = vld [vmem:[#allocation2 + $0x168] sm:$0xff] }
  0x1c   :  { %1974 = vmatprep.subr.bf16.mxu0 %v1973_v10  ;;  %v585_v54 = vld [vmem:[#allocation2 + $0x100] sm:$0xff]  ;;  %v1039_v51 = vld [vmem:[#allocation2 + $0x188] sm:$0xff] }
  0x1d   :  { %v1989_v55 = vpack.c.bf16 %v585_v54, %v584_v53  ;;  %v586_v56 = vld [vmem:[#allocation2 + $0x120] sm:$0xff]  ;;  %v1122_v53 = vld [vmem:[#allocation2 + $0x1a8] sm:$0xff] }
  0x1e   :  { %v587_v57 = vld [vmem:[#allocation2 + $0x140] sm:$0xff]  ;;  %v1126_v54 = vld [vmem:[#allocation2 + $0x1c8] sm:$0xff] }
  0x1f   :  { %1976 = vmatpush3.bf16.msra.mxu0 %v1973_v10  ;;  %v1993_v58 = vpack.c.bf16 %v587_v57, %v586_v56  ;;  %v588_v59 = vld [vmem:[#allocation2 + $0x160] sm:$0xff]  ;;  %v2025_v56 = vpack.c.bf16 %v1126_v54, %v1122_v53  ;;  %v1336_v53 = vld [vmem:[#allocation2 + $0x2b8] sm:$0xff] }
  0x20   :  { %1848 = vmatprep.subr.msk.mxu0 %vm36_vm0, %v121_v11  ;;  %v589_v60 = vld [vmem:[#allocation2 + $0x180] sm:$0xff] }
  0x21   :  { %v1997_v61 = vpack.c.bf16 %v589_v60, %v588_v59  ;;  %v1125_v57 = vld [vmem:[#allocation2 + $0x1c0] sm:$0xff]  ;;  %v1134_v59 = vld [vmem:[#allocation2 + $0x208] sm:$0xff] }
  0x22   :  { %v1129_v62 = vld [vmem:[#allocation2 + $0x1e0] sm:$0xff] }
  0x23   :  { %1849 = vmatpush3.msk.msra.mxu0 %vm36_vm0, %v121_v11  ;;  %v1133_v63 = vld [vmem:[#allocation2 + $0x200] sm:$0xff] }
  0x24   :  { %1978 = vmatprep.subr.bf16.mxu0 %v1977_v14  ;;  %v2031_v0 = vpack.c.bf16 %v1133_v63, %v1129_v62  ;;  %v1331_v63 = vld [vmem:[#allocation2 + $0x290] sm:$0xff] }
  0xed   :  { %v1839_v15 = vpop.f32.mrb[0].mxu0 }
  0xee   :  { %v106_v18 = vpop.f32.mrb[1].mxu0  ;;  %v116_v20 = vmax.f32 %v1839_v15, 0.0 }
  0xef   :  { %v115_v19 = vmax.f32 %v106_v18, 0.0 }
  0xf1   :  { %1850 = vmatprep.mubr.msk.f32.mxu0 %vm122_vm4, %v115_v19 }
  0xf2   :  { %1851 = vmatmul.mubr.msk.f32.vlgmr.msra.gmra.mrb[2].mxu0 %vm122_vm4, %v116_v20 }
  0xf3   :  { %1980 = vmatpush3.bf16.msra.mxu0 %v1977_v14 }
  0xf4   :  { %1982 = vmatprep.subr.bf16.mxu0 %v1981_v21 }
  0xf7   :  { %1984 = vmatpush3.bf16.msra.mxu0 %v1981_v21 }
  0xf8   :  { %1861 = vmatprep.subr.msk.mxu0 %vm36_vm0, %v216_v22 }
  0xfb   :  { %1862 = vmatpush3.msk.msra.mxu0 %vm36_vm0, %v216_v22 }
  0xfc   :  { %1871 = vmatprep.subr.msk.mxu0 %vm417_vm8, %v2203_v40 }
 0x1c5   :  { %v2171_v23 = vpop.f32.mrb[2].mxu0 }
 0x1c6   :  { %v2173_v24 = vpop.f32.mrb[3].mxu0  ;;  %v208_v26 = vmax.f32 %v2171_v23, 0.0 }
 0x1c7   :  { %v207_v25 = vmax.f32 %v2173_v24, 0.0 }
 0x1c9   :  { %1863 = vmatprep.mubr.msk.f32.mxu0 %vm122_vm4, %v207_v25 }
 0x1ca   :  { %1864 = vmatmul.mubr.msk.f32.vlgmr.msra.gmra.mrb[4].mxu0 %vm122_vm4, %v208_v26 }
 0x1cb   :  { %1872 = vmatpush3.msk.msra.mxu0 %vm417_vm8, %v2203_v40 }
 0x1cc   :  { %1986 = vmatprep.subr.bf16.mxu0 %v1985_v52 }
 0x29d   :  { %v2183_v27 = vpop.f32.mrb[4].mxu0 }
 0x29e   :  { %v2185_v28 = vpop.f32.mrb[5].mxu0 }
 0x29f   :  { %303 = vrot.lane.b32.xlu0 %v2185_v28, %s2125_s0 }
 0x2a3   :  { %305 = vrot.lane.b32.xlu0 %v2183_v27, %s2125_s0 }
 0x311   :  { %v304_v30 = vpop.permute.xlu0 %303 }
 0x312   :  { %v309_v31 = vmul.f32 %v304_v30, %v2185_v28 }
 0x314   :  { %313 = vrot.lane.b32.xlu1 %v309_v31, %s2126_s26 }
 0x315   :  { %v306_v32 = vpop.permute.xlu0 %305 }
 0x316   :  { %v310_v33 = vmul.f32 %v2183_v27, %v306_v32 }
 0x318   :  { %315 = vrot.lane.b32.xlu1 %v310_v33, %s2126_s26 }
 0x386   :  { %v314_v34 = vpop.permute.xlu1 %313 }
 0x387   :  { %1868 = vmatprep.mubr.msk.f32.mxu1 %vm317_vm5, %v314_v34 }
 0x38a   :  { %v316_v35 = vpop.permute.xlu1 %315 }
 0x38b   :  { %1869 = vmatmul.mubr.msk.f32.vlgmr.msra.gmra.mrb[0].mxu1 %vm317_vm5, %v316_v35 }
 0x38c   :  { %1877 = vmatpush3.msk.msra.mxu1 %vm417_vm8, %v2205_v41 }
 0x38d   :  { %2002 = vmatprep.subr.bf16.mxu1 %v2001_v1 }
 0x45e   :  { %v1870_v36 = vpop.f32.mrb[0].mxu1 }
 0x45f   :  { %v388_v37 = vpop.f32.mrb[1].mxu1  ;;  %v402_v38 = vsel %vm401_vm6, %v1870_v36, -inf }
 0x460   :  { %403 = vmax.xlane.f32.xlu1 %v402_v38  ;;  %v398_v39 = vsel %vm397_vm7, %v388_v37, -inf }
 0x461   :  { %399 = vmax.xlane.f32.xlu0 %v398_v39 }
 0x4ed   :  { %v404_v42 = vpop.xlane.xlu1 %403 }
 0x4ee   :  { %v406_v43 = vsub.f32 %v1870_v36, %v404_v42  ;;  %v400_v44 = vpop.xlane.xlu0 %399  ;;  %v1033_v42 = vld [vmem:[#allocation2 + $0xc8] sm:$0xff] }
 0x4ef   :  { %v405_v45 = vsub.f32 %v388_v37, %v400_v44  ;;  %v1034_v44 = vld [vmem:[#allocation2 + $0xe8] sm:$0xff] }
 0x4f0   :  { %v409_v46 = vmul.f32 1.442695, %v406_v43 }
 0x4f1   :  { %v407_v47 = vmul.f32 1.442695, %v405_v45  ;;  %v1035_v45 = vld [vmem:[#allocation2 + $0x108] sm:$0xff] }
 0x4f3   :  { %2079 = vpow2.f32 %v407_v47  ;;  %v1036_v47 = vld [vmem:[#allocation2 + $0x128] sm:$0xff] }
 0x4f4   :  { %2081 = vpow2.f32 %v409_v46  ;;  %v2013_v46 = vpack.c.bf16 %v1035_v45, %v1034_v44 }
 0x4fd   :  { %v2080_v48 = vpop.eup %2079 }
 0x4fe   :  { %v2082_v49 = vpop.eup %2081  ;;  %1873 = vmatprep.mubr.msk.f32.mxu0 %vm397_vm7, %v2080_v48  ;;  %1878 = vmatprep.mubr.msk.f32.mxu1 %vm397_vm7, %v2080_v48  ;;  %v1037_v48 = vld [vmem:[#allocation2 + $0x148] sm:$0xff] }
 0x4ff   :  { %1874 = vmatmul.mubr.msk.f32.vlgmr.msra.gmra.mrb[6].mxu0 %vm397_vm7, %v2082_v49  ;;  %1879 = vmatmul.mubr.msk.f32.vlgmr.msra.gmra.mrb[2].mxu1 %vm397_vm7, %v2082_v49  ;;  %v2017_v49 = vpack.c.bf16 %v1037_v48, %v1036_v47  ;;  %v1324_v47 = vld [vmem:[#allocation2 + $0x258] sm:$0xff] }
 0x500   :  { %1988 = vmatpush3.bf16.msra.mxu0 %v1985_v52  ;;  %2004 = vmatpush3.bf16.msra.mxu1 %v2001_v1  ;;  %v2021_v52 = vpack.c.bf16 %v1039_v51, %v1038_v50  ;;  %v1327_v50 = vld [vmem:[#allocation2 + $0x270] sm:$0xff] }
 0x501   :  { %1990 = vmatprep.subr.bf16.mxu0 %v1989_v55  ;;  %2006 = vmatprep.subr.bf16.mxu1 %v2005_v3 }
 0x504   :  { %1992 = vmatpush3.bf16.msra.mxu0 %v1989_v55  ;;  %2008 = vmatpush3.bf16.msra.mxu1 %v2005_v3  ;;  %v1121_v55 = vld [vmem:[#allocation2 + $0x1a0] sm:$0xff] }
 0x505   :  { %1994 = vmatprep.subr.bf16.mxu0 %v1993_v58  ;;  %1908 = vmatprep.subr.msk.mxu1 %vm36_vm0, %v676_v16  ;;  %v2027_v60 = vpack.c.bf16 %v1125_v57, %v1121_v55 }
 0x508   :  { %1996 = vmatpush3.bf16.msra.mxu0 %v1993_v58  ;;  %1909 = vmatpush3.msk.msra.mxu1 %vm36_vm0, %v676_v16  ;;  %v1130_v58 = vld [vmem:[#allocation2 + $0x1e8] sm:$0xff]  ;;  %v1137_v16 = vld [vmem:[#allocation2 + $0x220] sm:$0x1] }
 0x509   :  { %1998 = vmatprep.subr.bf16.mxu0 %v1997_v61  ;;  %1913 = vmatprep.subr.mxu1 %v2191_v29 }
 0x50c   :  { %2000 = vmatpush3.bf16.msra.mxu0 %v1997_v61  ;;  %v2029_v61 = vpack.c.bf16 %v1134_v59, %v1130_v58 }
 0x50d   :  { %1923 = vmatprep.subr.msk.mxu0 %vm417_vm8, %v2205_v41 }
 0x5d2   :  { %v1875_v4 = vpop.f32.mrb[6].mxu0  ;;  %v1880_v5 = vpop.f32.mrb[2].mxu1 }
 0x5d3   :  { %v575_v6 = vmax.f32 %v1880_v5, 1e-30  ;;  %v487_v7 = vpop.f32.mrb[7].mxu0  ;;  %v565_v8 = vpop.f32.mrb[3].mxu1 }
 0x5d4   :  { %v574_v9 = vmax.f32 %v565_v8, 1e-30 }
 0x5d5   :  { %2083 = vrcp.f32 %v575_v6 }
 0x5d6   :  { %2085 = vrcp.f32 %v574_v9 }
 0x5df   :  { %v2084_v10 = vpop.eup %2083 }
 0x5e0   :  { %v2086_v11 = vpop.eup %2085  ;;  %v579_v12 = vmul.f32 %v2084_v10, %v1875_v4 }
 0x5e1   :  { %v578_v13 = vmul.f32 %v2086_v11, %v487_v7 }
 0x5e2   :  { %v581_v14 = vmul.f32 %v2183_v27, %v579_v12 }
 0x5e3   :  { %v580_v15 = vmul.f32 %v578_v13, %v2185_v28  ;;  %v1138_v13 = vld [vmem:[#allocation2 + $0x228] sm:$0x1] }
 0x5e5   :  { %1897 = vmatprep.mubr.msk.f32.mxu0 %vm590_vm9, %v580_v15  ;;  %v1128_v15 = vld [vmem:[#allocation2 + $0x1d8] sm:$0xff] }
 0x5e6   :  { %1898 = vmatmul.mubr.msk.f32.vlgmr.msra.gmra.mrb[8].mxu0 %vm590_vm9, %v581_v14  ;;  %v1124_v14 = vld [vmem:[#allocation2 + $0x1b8] sm:$0xff] }
 0x5e7   :  { %1924 = vmatpush3.msk.msra.mxu0 %vm417_vm8, %v2205_v41 }
 0x5e8   :  { %2026 = vmatprep.subr.bf16.mxu0 %v2025_v56 }
 0x6b9   :  { %v1899_v17 = vpop.f32.mrb[8].mxu0 }
 0x6ba   :  { %v663_v18 = vpop.f32.mrb[9].mxu0  ;;  %v2236_v20 = vadd.f32 %v1899_v17, %v208_v26  ;;  %v2033_v17 = vpack.c.bf16 %v1128_v15, %v1124_v14  ;;  %v1493_v14 = vld [vmem:[#allocation2 + $0x78] sm:$0xff] }
 0x6bb   :  { %v2232_v19 = vadd.f32 %v663_v18, %v207_v25  ;;  %v2127_v18 = vmov 0.0  }
 0x6bd   :  { %1910 = vmatprep.mubr.msk.f32.mxu1 %vm122_vm4, %v2232_v19 }
 0x6be   :  { %1911 = vmatmul.mubr.msk.f32.vlgmr.msra.gmra.mrb[4].mxu1 %vm122_vm4, %v2236_v20 }
 0x6bf   :  { %1914 = vmatpush3.msra.mxu1 %v2191_v29 }
 0x6c0   :  { %1918 = vmatprep.subr.msk.mxu1 %vm417_vm8, %v2203_v40 }
 0x791   :  { %v2245_v21 = vpop.f32.mrb[4].mxu1 }
 0x792   :  { %765 = vrot.lane.b32.xlu1 %v2245_v21, %s2125_s0  ;;  %v2249_v22 = vpop.f32.mrb[5].mxu1 }
 0x793   :  { %763 = vrot.lane.b32.xlu0 %v2249_v22, %s2125_s0 }
 0x804   :  { %v766_v23 = vpop.permute.xlu1 %765 }
 0x805   :  { %v770_v24 = vmul.f32 %v2245_v21, %v766_v23  ;;  %v764_v25 = vpop.permute.xlu0 %763  ;;  %v1326_v23 = vld [vmem:[#allocation2 + $0x268] sm:$0xff] }
 0x806   :  { %v769_v26 = vmul.f32 %v764_v25, %v2249_v22  ;;  %v1325_v25 = vld [vmem:[#allocation2 + $0x260] sm:$0xff] }
 0x807   :  { %775 = vrot.lane.b32.xlu1 %v770_v24, %s2126_s26 }
 0x808   :  { %773 = vrot.lane.b32.xlu0 %v769_v26, %s2126_s26  ;;  %v1330_v26 = vld [vmem:[#allocation2 + $0x288] sm:$0xff] }
 0x879   :  { %v776_v28 = vpop.permute.xlu1 %775 }
 0x87a   :  { %v774_v27 = vpop.permute.xlu0 %773 }
 0x87b   :  { %1915 = vmatprep.mubr.msk.f32.mxu1 %vm317_vm5, %v774_v27  ;;  %v1334_v27 = vld [vmem:[#allocation2 + $0x2a8] sm:$0xff] }
 0x87c   :  { %1916 = vmatmul.mubr.msk.f32.vlgmr.msra.gmra.mrb[6].mxu1 %vm317_vm5, %v776_v28 }
 0x87d   :  { %1919 = vmatpush3.msk.msra.mxu1 %vm417_vm8, %v2203_v40  ;;  %v1032_v40 = vld [vmem:[#allocation2 + $0xa8] sm:$0xff] }
 0x87e   :  { %v2009_v43 = vpack.c.bf16 %v1033_v42, %v1032_v40  ;;  %v1131_v42 = vld [vmem:[#allocation2 + $0x1f0] sm:$0xff] }
 0x880   :  { %2010 = vmatprep.subr.bf16.mxu1 %v2009_v43 }
 0x94f   :  { %v1917_v29 = vpop.f32.mrb[6].mxu1 }
 0x950   :  { %v847_v30 = vpop.f32.mrb[7].mxu1  ;;  %v859_v31 = vsel %vm401_vm6, %v1917_v29, -inf }
 0x951   :  { %860 = vmax.xlane.f32.xlu1 %v859_v31  ;;  %v856_v32 = vsel %vm397_vm7, %v847_v30, -inf  ;;  %v1333_v31 = vld [vmem:[#allocation2 + $0x2a0] sm:$0xff] }
 0x952   :  { %857 = vmax.xlane.f32.xlu0 %v856_v32 }
 0x9de   :  { %v861_v33 = vpop.xlane.xlu1 %860 }
 0x9df   :  { %v863_v34 = vsub.f32 %v1917_v29, %v861_v33  ;;  %v858_v35 = vpop.xlane.xlu0 %857  ;;  %v2045_v29 = vpack.c.bf16 %v1334_v27, %v1330_v26  ;;  %v1123_v33 = vld [vmem:[#allocation2 + $0x1b0] sm:$0xff] }
 0x9e0   :  { %v862_v36 = vsub.f32 %v847_v30, %v858_v35  ;;  %v1329_v30 = vld [vmem:[#allocation2 + $0x280] sm:$0xff]  ;;  %v1132_v35 = vld [vmem:[#allocation2 + $0x1f8] sm:$0xff] }
 0x9e1   :  { %v866_v37 = vmul.f32 1.442695, %v863_v34  ;;  %v2047_v32 = vpack.c.bf16 %v1333_v31, %v1329_v30  ;;  %v1127_v34 = vld [vmem:[#allocation2 + $0x1d0] sm:$0xff] }
 0x9e2   :  { %v864_v38 = vmul.f32 1.442695, %v862_v36  ;;  %v1136_v36 = vld [vmem:[#allocation2 + $0x218] sm:$0xff] }
 0x9e3   :  { %v2037_v40 = vpack.c.bf16 %v1136_v36, %v1132_v35 }
 0x9e4   :  { %2087 = vpow2.f32 %v864_v38 }
 0x9e5   :  { %2089 = vpow2.f32 %v866_v37 }
 0x9ee   :  { %v2088_v39 = vpop.eup %2087 }
 0x9ef   :  { %v2090_v41 = vpop.eup %2089  ;;  %1920 = vmatprep.mubr.msk.f32.mxu1 %vm397_vm7, %v2088_v39  ;;  %1925 = vmatprep.mubr.msk.f32.mxu0 %vm397_vm7, %v2088_v39  ;;  %v2035_v39 = vpack.c.bf16 %v1127_v34, %v1123_v33 }
 0x9f0   :  { %1921 = vmatmul.mubr.msk.f32.vlgmr.msra.gmra.mrb[8].mxu1 %vm397_vm7, %v2090_v41  ;;  %1926 = vmatmul.mubr.msk.f32.vlgmr.msra.gmra.mrb[10].mxu0 %vm397_vm7, %v2090_v41 }
 0x9f1   :  { %2012 = vmatpush3.bf16.msra.mxu1 %v2009_v43  ;;  %2028 = vmatpush1.bf16.msra.mxu0 %v2027_v60  ;;  %v1135_v43 = vld [vmem:[#allocation2 + $0x210] sm:$0xff] }
 0x9f2   :  { %2014 = vmatprep.subr.bf16.mxu1 %v2013_v46  ;;  %2030 = vmatprep.subr.bf16.mxu0 %v2029_v61  ;;  %v2039_v44 = vpack.c.bf16 %v1135_v43, %v1131_v42 }
 0x9f3   :  { %1223 = vmatprep.mubr.f32.mxu0 %v2127_v18 }
 0x9f5   :  { %2016 = vmatpush3.bf16.msra.mxu1 %v2013_v46  ;;  %2032 = vmatpush1.bf16.msra.mxu0 %v2031_v0  ;;  %v1140_v46 = vld [vmem:[#allocation2 + $0x238] sm:$0x1]  ;;  %v1335_v0 = vld [vmem:[#allocation2 + $0x2b0] sm:$0xff] }
 0x9f6   :  { %2018 = vmatprep.subr.bf16.mxu1 %v2017_v49  ;;  %1750 = vmatprep.subr.msk.mxu0 %vm36_vm0, %v1138_v13  ;;  %v1492_v13 = vld [vmem:[#allocation2 + $0x58] sm:$0xff] }
 0x9f7   :  { %v2061_v15 = vpack.c.bf16 %v1493_v14, %v1492_v13 }
 0x9f9   :  { %2020 = vmatpush3.bf16.msra.mxu1 %v2017_v49  ;;  %1751 = vmatpush1.msk.msra.mxu0 %vm36_vm0, %v1137_v16  ;;  %v1323_v49 = vld [vmem:[#allocation2 + $0x250] sm:$0xff] }
 0x9fa   :  { %2022 = vmatprep.subr.bf16.mxu1 %v2021_v52  ;;  %2034 = vmatprep.subr.bf16.mxu0 %v2033_v17  ;;  %v2051_v56 = vpack.c.bf16 %v1327_v50, %v1323_v49  ;;  %v1337_v16 = vld [vmem:[#allocation2 + $0x150] ss:$0 sm:$0xff] }
 0x9fd   :  { %2024 = vmatpush3.bf16.msra.mxu1 %v2021_v52  ;;  %v1332_v52 = vld [vmem:[#allocation2 + $0x298] sm:$0xff] }
 0x9fe   :  { %v2053_v58 = vpack.c.bf16 %v1336_v53, %v1332_v52 }
 0xac3   :  { %v1922_v1 = vpop.f32.mrb[8].mxu1  ;;  %v1927_v2 = vpop.f32.mrb[10].mxu0 }
 0xac4   :  { %v1025_v3 = vmax.f32 %v1927_v2, 1e-30  ;;  %v940_v4 = vpop.f32.mrb[9].mxu1  ;;  %v1015_v5 = vpop.f32.mrb[11].mxu0  ;;  %v2055_v2 = vpack.c.bf16 %v1335_v0, %v1331_v63 }
 0xac5   :  { %v1024_v6 = vmax.f32 %v1015_v5, 1e-30 }
 0xac6   :  { %2091 = vrcp.f32 %v1025_v3 }
 0xac7   :  { %2093 = vrcp.f32 %v1024_v6 }
 0xad0   :  { %v2092_v7 = vpop.eup %2091 }
 0xad1   :  { %v2094_v8 = vpop.eup %2093  ;;  %v1029_v9 = vmul.f32 %v2092_v7, %v1922_v1 }
 0xad2   :  { %v1028_v10 = vmul.f32 %v2094_v8, %v940_v4 }
 0xad3   :  { %v1031_v11 = vmul.f32 %v2245_v21, %v1029_v9  ;;  %v1322_v21 = vld [vmem:[#allocation2 + $0x248] sm:$0xff] }
 0xad4   :  { %v1030_v12 = vmul.f32 %v1028_v10, %v2249_v22  ;;  %v1321_v22 = vld [vmem:[#allocation2 + $0x240] sm:$0xff]  ;;  %v2041_v24 = vpack.c.bf16 %v1326_v23, %v1322_v21  ;;  %v1490_v10 = vld [vmem:[#allocation2 + $0x18] sm:$0xff] }
 0xad5   :  { %v2043_v28 = vpack.c.bf16 %v1325_v25, %v1321_v22 }
 0xad6   :  { %1944 = vmatprep.mubr.msk.f32.mxu1 %vm590_vm9, %v1030_v12  ;;  %2042 = vmatprep.subr.bf16.mxu1 %v2041_v24 }
 0xad7   :  { %1945 = vmatmul.mubr.msk.f32.vlgmr.msra.gmra.mrb[10].mxu1 %vm590_vm9, %v1031_v11  ;;  %v1491_v11 = vld [vmem:[#allocation2 + $0x38] sm:$0xff] }
 0xad8   :  { %2044 = vmatpush1.bf16.xpose.msra.mxu1 %v2043_v28  ;;  %v2057_v12 = vpack.c.bf16 %v1491_v11, %v1490_v10  ;;  %v1494_v28 = vld [vmem:[#allocation2 + $0x170] ss:$0 sm:$0xff] }
 0xad9   :  { %2046 = vmatprep.subr.bf16.mxu1 %v2045_v29 }
 0xae0   :  { %2048 = vmatpush1.bf16.xpose.msra.mxu1 %v2047_v32 }
 0xbaa   :  { %v1946_v37 = vpop.f32.mrb[10].mxu1 }
 0xbab   :  { %v1112_v38 = vpop.f32.mrb[11].mxu1  ;;  %v1118_v45 = vadd.f32 %v1946_v37, %v2236_v20  ;;  %v1328_v20 = vld [vmem:[#allocation2 + $0x278] sm:$0xff] }
 0xbac   :  { %v1113_v41 = vadd.f32 %v1112_v38, %v2232_v19  ;;  %v1139_v19 = vld [vmem:[#allocation2 + $0x230] sm:$0x1]  ;;  %v2049_v48 = vpack.c.bf16 %v1328_v20, %v1324_v47 }
 0xbae   :  { %1752 = vmatmul.mubr.msk.f32.vlgmr.msra.gmra.mrb[12].mxu0 %vm122_vm4, %v1113_v41  ;;  %2050 = vmatprep.subr.bf16.mxu1 %v2049_v48 }
 0xbaf   :  { %2036 = vmatpush1.bf16.msra.mxu0 %v2035_v39  ;;  %1229 = vmatprep.mubr.f32.mxu0 %v2127_v18 }
 0xbb0   :  { %2038 = vmatprep.subr.bf16.mxu0 %v2037_v40 }
 0xbb2   :  { %1753 = vmatmul.mubr.msk.f32.gmra.mrb[14].mxu0 %vm122_vm4, %v1118_v45 }
 0xbb3   :  { %2040 = vmatpush1.bf16.msra.mxu0 %v2039_v44  ;;  %1300 = vmatprep.mubr.f32.mxu0 %v2127_v18 }
 0xbb4   :  { %1754 = vmatprep.subr.msk.mxu0 %vm36_vm0, %v1140_v46 }
 0xbb7   :  { %1755 = vmatpush1.msk.msra.mxu0 %vm36_vm0, %v1139_v19 }
 0xbb8   :  { %1756 = vmatmul.mubr.msk.f32.vlgmr.msra.gmra.mrb[16].mxu0 %vm122_vm4, %v1113_v41  ;;  %2058 = vmatprep.subr.bf16.mxu0 %v2057_v12 }
 0xbb9   :  { %1306 = vmatprep.mubr.f32.mxu0 %v2127_v18  ;;  %2060 = vmatpush3.bf16.msra.mxu0 %v2057_v12 }
 0xbba   :  { %2062 = vmatprep.subr.bf16.mxu0 %v2061_v15 }
 0xbbc   :  { %1757 = vmatmul.mubr.msk.f32.gmra.mrb[18].mxu0 %vm122_vm4, %v1118_v45 }
 0xbbd   :  { %2064 = vmatpush3.bf16.msra.mxu0 %v2061_v15 }
 0xbbe   :  { %1958 = vmatprep.subr.mxu0 %v2127_v18 }
 0xc81   :  { %v1225_v51 = vpop.f32.mrb[12].mxu0 }
 0xc82   :  { %v1227_v54 = vpop.f32.mrb[13].mxu0  ;;  %v1313_v57 = vmax.f32 %v1225_v51, 0.0 }
 0xc83   :  { %v1314_v55 = vmax.f32 %v1227_v54, 0.0 }
 0xc85   :  { %v1231_v59 = vpop.f32.mrb[14].mxu0  ;;  %1402 = vmatprep.mubr.f32.mxu1 %v1314_v55 }
 0xc86   :  { %v1233_v60 = vpop.f32.mrb[15].mxu0  ;;  %1403 = vmatmul.mubr.f32.vlgmr.msra.gmra.mrb[12].mxu1 %v1313_v57  ;;  %v1317_v62 = vmax.f32 %v1231_v59, 0.0 }
 0xc87   :  { %v1318_v61 = vmax.f32 %v1233_v60, 0.0  ;;  %2052 = vmatpush1.bf16.xpose.msra.mxu1 %v2051_v56 }
 0xc88   :  { %2054 = vmatprep.subr.bf16.mxu1 %v2053_v58 }
 0xc89   :  { %1407 = vmatprep.mubr.f32.mxu1 %v1318_v61 }
 0xc8a   :  { %1408 = vmatmul.mubr.f32.gmra.mrb[14].mxu1 %v1317_v62 }
 0xc8b   :  { %v1302_v1 = vpop.f32.mrb[16].mxu0 }
 0xc8c   :  { %v1304_v3 = vpop.f32.mrb[17].mxu0  ;;  %v1315_v7 = vmax.f32 %v1302_v1, 0.0 }
 0xc8d   :  { %v1316_v4 = vmax.f32 %v1304_v3, 0.0 }
 0xc8f   :  { %v1308_v5 = vpop.f32.mrb[18].mxu0  ;;  %2056 = vmatpush1.bf16.xpose.msra.mxu1 %v2055_v2  ;;  %1477 = vmatprep.mubr.f32.mxu1 %v1316_v4 }
 0xc90   :  { %v1310_v6 = vpop.f32.mrb[19].mxu0  ;;  %v1319_v9 = vmax.f32 %v1308_v5, 0.0 }
 0xc91   :  { %v1320_v8 = vmax.f32 %v1310_v6, 0.0 }
 0xc96   :  { %1478 = vmatmul.mubr.f32.vlgmr.msra.gmra.mrb[12].mxu1 %v1315_v7 }
 0xc97   :  { %1482 = vmatprep.mubr.f32.mxu1 %v1320_v8 }
 0xc9a   :  { %1483 = vmatmul.mubr.f32.gmra.mrb[14].mxu1 %v1319_v9 }
 0xd69   :  { %v1479_v17 = vpop.f32.mrb[12].mxu1 }
 0xd6a   :  { %v2065_v21 = vadd.f32 %v1479_v17, %v1337_v16  ;;  %v1481_v23 = vpop.f32.mrb[13].mxu1 }
 0xd6c   :  { %v1488_v22 = vmax.f32 %v2065_v21, 0.0 }
 0xd6d   :  { %v1484_v24 = vpop.f32.mrb[14].mxu1 }
 0xd6e   :  { %v2066_v25 = vadd.f32 %v1484_v24, %v1337_v16  ;;  %v1486_v26 = vpop.f32.mrb[15].mxu1  ;;  %1955 = vmatprep.mubr.msk.f32.mxu0 %vm1495_vm10, %v1488_v22 }
 0xd70   :  { %v1489_v27 = vmax.f32 %v2066_v25, 0.0 }
 0xd72   :  { %1956 = vmatmul.mubr.msk.f32.vlgmr.msra.gmra.mrb[20].mxu0 %vm1495_vm10, %v1489_v27 }
 0xd73   :  { %1960 = vmatprep.mubr.msk.f32.mxu0 %vm2128_vm11, %v2127_v18 }
 0xe45   :  { %v1957_v29 = vpop.f32.mrb[20].mxu0 }
 0xe46   :  { %v1574_v30 = vadd.f32 %v1957_v29, %v1494_v28  ;;  %v1568_v31 = vpop.f32.mrb[21].mxu0 }
 0xe47   :  { %v1569_v32 = vadd.f32 %v1568_v31, %v1494_v28 }
 0xe48   :  { %1578 = vxpose.xlu0.b32.start.end [1/1] (short) (narrow) %v1574_v30, 8 }
 0xe49   :  { %v1577_v33 = vadd.f32 1e-06, %v1569_v32 }
 0xe4b   :  { %v1686_v34 = vmul.f32 %v1577_v33, %v1577_v33 }
 0xe4d   :  { %v1688_v35 = vsel %vm1687_vm12, %v1686_v34, 0.0 }
 0xe4e   :  { %1689 = vadd.xlane.f32.xlu1 %v1688_v35 }
 0xec8   :  { %v1594_v36 = vpop.trf.xlu0 }
 0xec9   :  { %1959 = vmatpush3.msk.msra.mxu0 %vm417_vm8, %v1594_v36  ;;  %v1691_v37 = vmul.f32 %v1594_v36, %v1594_v36 }
 0xeca   :  { %1961 = vmatmul.mubr.msk.f32.vlgmr.msra.gmra.mrb[22].mxu0 %vm397_vm7, %v1577_v33 }
 0xecb   :  { %v1693_v38 = vsel %vm1692_vm13, %v1691_v37, 0.0 }
 0xecc   :  { %v1694_v39 = vrot.slane %v1693_v38, 4 }
 0xece   :  { %v1695_v41 = vadd.f32 %v1694_v39, %v1693_v38 }
 0xed0   :  { %v1696_v40 = vrot.slane %v1695_v41, 2 }
 0xed2   :  { %v1697_v42 = vadd.f32 %v1696_v40, %v1695_v41 }
 0xed4   :  { %v1698_v43 = vrot.slane %v1697_v42, 1 }
 0xed6   :  { %v1699_v45 = vadd.f32 %v1698_v43, %v1697_v42 }
 0xedb   :  { %v1690_v44 = vpop.xlane.xlu1 %1689 }
 0xedc   :  { %v1700_v46 = vadd.f32 %v1699_v45, %v1690_v44 }
 0xf9d   :  { %v1682_v18 = vpop.f32.mrb[22].mxu0 }
 0xf9e   :  { %v1701_v19 = vmul.f32 2.0, %v1682_v18  ;;  %v1962_v47 = vpop.f32.mrb[23].mxu0 }
 0xfa0   :  { %v1702_v20 = vsub.f32 %v1700_v46, %v1701_v19 }
 0xfa2   :  { %v1703_v48 = vmax.f32 %v1702_v20, 0.0 }
 0xfa4   :  { %2095 = vrsqrt.f32 %v1703_v48  ;;  %vm1706_vm14 = vcmp.eq.f32.partialorder %v1703_v48, inf  ;;  %v1709_v51 = vand.u32 2147483648, %v1703_v48  ;;  %vm1708_vm0 = vcmp.eq.f32.partialorder %v1703_v48, 0.0 }
 0xfae   :  { %v2096_v49 = vpop.eup %2095 }
 0xfaf   :  { %v1705_v50 = vmul.f32 %v2096_v49, %v1703_v48 }
 0xfb1   :  { %v1707_v52 = vsel %vm1706_vm14, %v1703_v48, %v1705_v50 }
 0xfb2   :  { %v1710_v53 = vsel %vm1708_vm0, %v1709_v51, %v1707_v52 }
 0xfb3   :  { %1712 = vst.msk [vmem:[%s2294_s2] sm:$0x3] %vm1711_vm15, %v1710_v53 }
 0xfb4   :  { %1717 = vsyncpa [#allocation3], 1 }

</bundles_post_ra>
